<compile_context>
chip_gen: v7x
topology: tpu7x:2x2x1
jax: 0.10.0
libtpu: 0.0.40
codegen_flags: <defaults>
</compile_context>

<pallas_src>
import functools

import jax
import jax.numpy as jnp
from jax import lax
from jax.experimental import pallas as pl
from jax.experimental.pallas import tpu as pltpu


_ROW_ALIGN = 32                      # int8 packs 32 rows per sublane group
_LANE_ALIGN = 128
_VMEM_BUDGET = 12 * 1024 * 1024      # stay under the smallest scoped default (16 MiB, v5e)


def _round_up(x, m):
    return ((x + m - 1) // m) * m


def _gcn_kernel(adj_ref, x_ref, wt_ref, b_ref, o_ref, acc_ref):
    """One (row-tile, k-tile) step of  out = (adj_t @ x) @ w^T + b."""
    k = pl.program_id(1)

    @pl.when(k == 0)
    def _():
        acc_ref[...] = jnp.zeros_like(acc_ref)

    # int8 0/1 adjacency -> bf16 (exact); bf16 x bf16 dot keeps the MXU on its
    # fast path with f32 accumulation.
    adj = adj_ref[...].astype(jnp.bfloat16)
    acc_ref[...] += jnp.dot(adj, x_ref[...], preferred_element_type=jnp.float32)

    @pl.when(k == pl.num_programs(1) - 1)
    def _():
        # Tiny epilogue: runs once per output tile, kept in f32 for precision.
        out = jnp.dot(acc_ref[...], wt_ref[...], preferred_element_type=jnp.float32)
        out = out + b_ref[...]
        o_ref[...] = out.astype(o_ref.dtype)


def _choose_tiles(n_nodes, f_in_pad, f_out_pad, tm, tk, out_itemsize):
    tile_m = min(tm, _round_up(n_nodes, _ROW_ALIGN))
    tile_k = min(tk, _round_up(n_nodes, _LANE_ALIGN))

    # v7x has 2 TensorCores: make sure the "parallel" row axis gets >= 2 blocks
    # so both cores have work (harmless on the single-TC v5e/v6e).
    if _round_up(n_nodes, tile_m) // tile_m < 2 and tile_m > _ROW_ALIGN:
        tile_m = max(_ROW_ALIGN, _round_up(tile_m // 2, _ROW_ALIGN))

    def vmem_bytes(t_m, t_k):
        return (2 * t_m * t_k * 1                 # adjacency tile, int8, double-buffered
                + 2 * t_k * f_in_pad * 2          # feature tile, bf16
                + 2 * f_in_pad * f_out_pad * 4    # resident W^T, f32
                + 2 * f_out_pad * 4               # resident bias
                + 2 * t_m * f_out_pad * out_itemsize
                + t_m * f_in_pad * 4)             # f32 accumulator

    # Shrink tiles (reduction tile first) if we'd blow the VMEM budget.
    while vmem_bytes(tile_m, tile_k) > _VMEM_BUDGET and tile_k > _LANE_ALIGN:
        tile_k = max(_LANE_ALIGN, _round_up(tile_k // 2, _LANE_ALIGN))
    while vmem_bytes(tile_m, tile_k) > _VMEM_BUDGET and tile_m > _ROW_ALIGN:
        tile_m = max(_ROW_ALIGN, _round_up(tile_m // 2, _ROW_ALIGN))

    return tile_m, tile_k


@functools.partial(jax.jit, static_argnames=("tm", "tk"))
def gcn_layer(adj_t, x, w, b, *, tm=512, tk=2048):
    """Fused GCNLayer forward.

    adj_t: [N, N] binary, adj_t[v, u] = 1 iff edge u -> v.
    x:     [N, F_in] node features.
    w:     [F_out, F_in], b: [F_out]  (nn.Linear parameters).
    """
    n_nodes, f_in = x.shape
    f_out, f_in_w = w.shape
    assert adj_t.shape == (n_nodes, n_nodes)
    assert f_in_w == f_in and b.shape == (f_out,)

    out_dtype = jnp.float32
    out_itemsize = jnp.dtype(out_dtype).itemsize
    f_in_pad = _round_up(f_in, _LANE_ALIGN)
    f_out_pad = _round_up(f_out, _LANE_ALIGN)

    tile_m, tile_k = _choose_tiles(n_nodes, f_in_pad, f_out_pad, tm, tk, out_itemsize)
    mp = _round_up(n_nodes, tile_m)
    kp = _round_up(n_nodes, tile_k)

    # Cast + pad fuse into a single HBM pass under jit.  Zero padding
    # contributes nothing to the sums and is sliced off at the end.
    adj_p = jnp.pad(adj_t.astype(jnp.int8),
                    ((0, mp - n_nodes), (0, kp - n_nodes)))
    x_p = jnp.pad(x.astype(jnp.bfloat16),
                  ((0, kp - n_nodes), (0, f_in_pad - f_in)))
    # Pre-transpose the tiny W on the wrapper side (keeps the in-kernel XLU
    # clear); it stays f32 and fully resident in VMEM.
    wt_p = jnp.pad(w.T.astype(jnp.float32),
                   ((0, f_in_pad - f_in), (0, f_out_pad - f_out)))
    b_p = jnp.pad(b.astype(jnp.float32), (0, f_out_pad - f_out)).reshape(1, f_out_pad)

    grid = (mp // tile_m, kp // tile_k)

    flops = 2 * mp * kp * f_in_pad + 2 * mp * f_in_pad * f_out_pad
    bytes_accessed = (adj_p.size                       # int8 adjacency (dominant stream)
                      + grid[0] * x_p.size * 2         # bf16 features, re-read per row tile
                      + wt_p.size * 4 + b_p.size * 4
                      + mp * f_out_pad * out_itemsize)
    cost = pl.CostEstimate(flops=flops, transcendentals=0,
                           bytes_accessed=bytes_accessed)

    out_p = pl.pallas_call(
        _gcn_kernel,
        out_shape=jax.ShapeDtypeStruct((mp, f_out_pad), out_dtype),
        grid_spec=pltpu.PrefetchScalarGridSpec(
            num_scalar_prefetch=0,
            grid=grid,
            in_specs=[
                # Dominant N^2 stream.  If an xprof trace shows exposed DMA at
                # large tk, bump this spec to pipeline_mode=pl.Buffered(3).
                pl.BlockSpec((tile_m, tile_k), lambda i, k: (i, k)),
                pl.BlockSpec((tile_k, f_in_pad), lambda i, k: (k, 0)),
                pl.BlockSpec((f_in_pad, f_out_pad), lambda i, k: (0, 0)),  # resident W^T
                pl.BlockSpec((1, f_out_pad), lambda i, k: (0, 0)),         # resident bias
            ],
            out_specs=pl.BlockSpec((tile_m, f_out_pad), lambda i, k: (i, 0)),
            scratch_shapes=[pltpu.VMEM((tile_m, f_in_pad), jnp.float32)],
        ),
        compiler_params=pltpu.CompilerParams(
            dimension_semantics=("parallel", "arbitrary")),
        cost_estimate=cost,
    )(adj_p, x_p, wt_p, b_p)

    return out_p[:n_nodes, :f_out]


if __name__ == "__main__":
    key = jax.random.PRNGKey(0)

    def build_graph(n):
        # Deterministic unweighted graph: self-loops + a ring (u -> u+1), so
        # every node has a non-empty mailbox (matches the DGL sum reduce).
        src = jnp.concatenate([jnp.arange(n), jnp.arange(n)])
        dst = jnp.concatenate([jnp.arange(n), (jnp.arange(n) + 1) % n])
        adj = jnp.zeros((n, n), dtype=jnp.float32).at[src, dst].set(1.0)  # adj[u, v]=1 iff u->v
        return adj.T                                                      # adj_t[v, u]

    def reference(adj_t, x, w, b):
        hp = lax.Precision.HIGHEST
        agg = jnp.dot(adj_t, x, precision=hp)
        return jnp.dot(agg, w.T, precision=hp) + b

    configs = [
        # (n_nodes, in_feats, out_feats, tile overrides)
        (256, 64, 32, dict(tm=128, tk=128)),  # multi-step k reduction, 2 row blocks
        (128, 16, 32, dict()),                # tiny features, heavy lane padding
        (200, 48, 24, dict()),                # unaligned shapes -> row/lane padding
    ]

    for idx, (n_nodes, in_feats, out_feats, tiles) in enumerate(configs):
        k_x, k_w, k_b = jax.random.split(jax.random.fold_in(key, idx), 3)
        w = jax.random.normal(k_w, (out_feats, in_feats), dtype=jnp.float32) * 0.1
        b = jax.random.normal(k_b, (out_feats,), dtype=jnp.float32) * 0.1
        x = jax.random.normal(k_x, (n_nodes, in_feats), dtype=jnp.float32)
        adj_t = build_graph(n_nodes)

        out = jax.block_until_ready(gcn_layer(adj_t, x, w, b, **tiles))
        ref = reference(adj_t, x, w, b)

        assert out.shape == (n_nodes, out_feats)
        max_err = float(jnp.max(jnp.abs(out - ref)))
        # bf16 feature path vs f32 HIGHEST reference: ~0.4% relative error expected.
        assert jnp.allclose(out, ref, atol=3e-2, rtol=3e-2), max_err

    print("KERNEL_OK")
</pallas_src>

<mosaic_0001>
module attributes {stable_mosaic.version = 11 : i64} {
  func.func @_gcn_kernel(%arg0: i32, %arg1: i32, %arg2: memref<128x128xi8, #tpu.memory_space<vmem>>, %arg3: memref<128x128xbf16, #tpu.memory_space<vmem>>, %arg4: memref<128x128xf32, #tpu.memory_space<vmem>>, %arg5: memref<1x128xf32, #tpu.memory_space<vmem>>, %arg6: memref<128x128xf32, #tpu.memory_space<vmem>>, %arg7: memref<128x128xf32, #tpu.memory_space<vmem>>) attributes {dimension_semantics = [#tpu.dimension_semantics<parallel>, #tpu.dimension_semantics<arbitrary>], iteration_bounds = array<i64: 2, 2>, scalar_prefetch = 0 : i64, scratch_operands = 1 : i64, tpu.core_type = #tpu.core_type<tc>, window_params = [{transform_indices = @transform_0, window_bounds = array<i64: 128, 128>}, {transform_indices = @transform_1, window_bounds = array<i64: 128, 128>}, {pipeline_mode = #tpu.pipeline_mode<synchronous>, transform_indices = @transform_2, window_bounds = array<i64: 128, 128>}, {pipeline_mode = #tpu.pipeline_mode<synchronous>, transform_indices = @transform_3, window_bounds = array<i64: 1, 128>}, {transform_indices = @transform_4, window_bounds = array<i64: 128, 128>}]} {
    %c0_i32 = arith.constant 0 : i32
    %0 = arith.cmpi eq, %arg1, %c0_i32 : i32
    %1 = arith.extui %0 : i1 to i32
    %c0_i32_0 = arith.constant 0 : i32
    %2 = arith.cmpi ne, %1, %c0_i32_0 : i32
    scf.if %2 {
      %cst_9 = arith.constant 0.000000e+00 : f32
      %13 = vector.broadcast %cst_9 : f32 to vector<128x128xf32>
      %c0_10 = arith.constant 0 : index
      %c0_11 = arith.constant 0 : index
      %14 = vector.load %arg7[%c0_10, %c0_11] : memref<128x128xf32, #tpu.memory_space<vmem>>, vector<128x128xf32>
      tpu.vector_store %arg7[%c0_10, %c0_11], %13 {strides = array<i32>} : memref<128x128xf32, #tpu.memory_space<vmem>>, vector<128x128xf32>,
    } else {
    }
    %c0 = arith.constant 0 : index
    %c0_1 = arith.constant 0 : index
    %3 = vector.load %arg2[%c0, %c0_1] : memref<128x128xi8, #tpu.memory_space<vmem>>, vector<128x128xi8>
    %4 = arith.sitofp %3 : vector<128x128xi8> to vector<128x128xbf16>
    %c0_2 = arith.constant 0 : index
    %c0_3 = arith.constant 0 : index
    %5 = vector.load %arg7[%c0_2, %c0_3] : memref<128x128xf32, #tpu.memory_space<vmem>>, vector<128x128xf32>
    %c0_4 = arith.constant 0 : index
    %c0_5 = arith.constant 0 : index
    %6 = vector.load %arg3[%c0_4, %c0_5] : memref<128x128xbf16, #tpu.memory_space<vmem>>, vector<128x128xbf16>
    %cst = arith.constant dense<0.000000e+00> : vector<128x128xf32>
    %7 = tpu.matmul %4, %6, %cst {dimension_numbers = #tpu.dot_dimension_numbers<[1], [0], [0], [1], [0, 0, 1, 1], [], []>} : vector<128x128xbf16>, vector<128x128xbf16>, vector<128x128xf32> -> vector<128x128xf32>
    %8 = arith.addf %5, %7 : vector<128x128xf32>
    %c0_6 = arith.constant 0 : index
    %c0_7 = arith.constant 0 : index
    %9 = vector.load %arg7[%c0_6, %c0_7] : memref<128x128xf32, #tpu.memory_space<vmem>>, vector<128x128xf32>
    tpu.vector_store %arg7[%c0_6, %c0_7], %8 {strides = array<i32>} : memref<128x128xf32, #tpu.memory_space<vmem>>, vector<128x128xf32>,
    %c1_i32 = arith.constant 1 : i32
    %10 = arith.cmpi eq, %arg1, %c1_i32 : i32
    %11 = arith.extui %10 : i1 to i32
    %c0_i32_8 = arith.constant 0 : i32
    %12 = arith.cmpi ne, %11, %c0_i32_8 : i32
    scf.if %12 {
      %c0_9 = arith.constant 0 : index
      %c0_10 = arith.constant 0 : index
      %13 = vector.load %arg7[%c0_9, %c0_10] : memref<128x128xf32, #tpu.memory_space<vmem>>, vector<128x128xf32>
      %c0_11 = arith.constant 0 : index
      %c0_12 = arith.constant 0 : index
      %14 = vector.load %arg4[%c0_11, %c0_12] : memref<128x128xf32, #tpu.memory_space<vmem>>, vector<128x128xf32>
      %cst_13 = arith.constant dense<0.000000e+00> : vector<128x128xf32>
      %15 = tpu.matmul %13, %14, %cst_13 {dimension_numbers = #tpu.dot_dimension_numbers<[1], [0], [0], [1], [0, 0, 1, 1], [], []>} : vector<128x128xf32>, vector<128x128xf32>, vector<128x128xf32> -> vector<128x128xf32>
      %c0_14 = arith.constant 0 : index
      %c0_15 = arith.constant 0 : index
      %16 = vector.load %arg5[%c0_14, %c0_15] : memref<1x128xf32, #tpu.memory_space<vmem>>, vector<1x128xf32>
      %17 = vector.broadcast %16 : vector<1x128xf32> to vector<128x128xf32>
      %18 = arith.addf %15, %17 : vector<128x128xf32>
      %c0_16 = arith.constant 0 : index
      %c0_17 = arith.constant 0 : index
      %19 = vector.load %arg6[%c0_16, %c0_17] : memref<128x128xf32, #tpu.memory_space<vmem>>, vector<128x128xf32>
      tpu.vector_store %arg6[%c0_16, %c0_17], %18 {strides = array<i32>} : memref<128x128xf32, #tpu.memory_space<vmem>>, vector<128x128xf32>,
    } else {
    }
    return
  }
  func.func @transform_0(%arg0: i32, %arg1: i32) -> (i32, i32) {
    %c0_i32 = arith.constant 0 : i32
    return %arg0, %arg1 : i32, i32
  }
  func.func @transform_1(%arg0: i32, %arg1: i32) -> (i32, i32) {
    %c0_i32 = arith.constant 0 : i32
    %c0_i32_0 = arith.constant 0 : i32
    return %arg1, %c0_i32 : i32, i32
  }
  func.func @transform_2(%arg0: i32, %arg1: i32) -> (i32, i32) {
    %c0_i32 = arith.constant 0 : i32
    %c0_i32_0 = arith.constant 0 : i32
    %c0_i32_1 = arith.constant 0 : i32
    return %c0_i32, %c0_i32_0 : i32, i32
  }
  func.func @transform_3(%arg0: i32, %arg1: i32) -> (i32, i32) {
    %c0_i32 = arith.constant 0 : i32
    %c0_i32_0 = arith.constant 0 : i32
    %c0_i32_1 = arith.constant 0 : i32
    return %c0_i32, %c0_i32_0 : i32, i32
  }
  func.func @transform_4(%arg0: i32, %arg1: i32) -> (i32, i32) {
    %c0_i32 = arith.constant 0 : i32
    %c0_i32_0 = arith.constant 0 : i32
    return %arg0, %c0_i32 : i32, i32
  }
}

</mosaic_0001>

<bundles_post_ra>
// kernel: gcn_layer.1
= control target key start
LH: loop header
LB: loop body
LE: loop exit
PB: predicated region body
PF: predicated region fallthrough
CT: control target
= control target key end

     0   :  { %s1194_s15 = smov 0   ;;  %s1196_s16 = smov 0   ;;  %s1373_s0 = inlined_call_operand.vmem [shape: s8[256,256], index: 0, kind: input, shape index: {}]   ;;  %s1374_s1 = inlined_call_operand.vmem [shape: bf16[256,128], index: 1, kind: input, shape index: {}]   ;;  %s1375_s2 = inlined_call_operand.vmem [shape: f32[128,128], index: 2, kind: input, shape index: {}]   ;;  %s1376_s3 = inlined_call_operand.vmem [shape: f32[1,128], index: 3, kind: input, shape index: {}]   ;;  %s1377_s4 = inlined_call_operand.vmem [shape: f32[256,128], index: 4, kind: output, shape index: {}]  }
   0x1   :  { %s1198_s17 = smov 0   ;;  %s1200_s18 = smov 0  }
   0x2   :  { %s1202_s19 = smov 0   ;;  %s1204_s20 = smov 0  }
   0x3   :  { %s1206_s21 = smov 0  }
   0x4 LB: > { %s23_s22 = sadd.s32 1, %s1158_s19  ;;  %s26_s23 = sadd.s32 1, %s1162_s20  ;;  %s1166_s21 = sphi %s1206_s21, %s14_s21   ;;  %s1162_s20 = sphi %s1204_s20, %s1383_s20   ;;  %s1158_s19 = sphi %s1202_s19, %s1382_s19   ;;  %s1154_s18 = sphi %s1200_s18, %s1381_s18   ;;  %s1150_s17 = sphi %s1198_s17, %s1380_s17   ;;  %s1146_s16 = sphi %s1196_s16, %s1379_s16   ;;  %s1142_s15 = sphi %s1194_s15, %s1378_s15  }
   0x5   : > { %p24_p0 = scmp.ge.s32.totalorder %s23_s22, 2  ;;  %p42_p1 = scmp.ne.s32.totalorder %s1146_s16, %s1142_s15 }
   0x6   : > { %p43_p2 = scmp.eq.s32.totalorder %s1166_s21, 0  ;;  %s35_s27 = sadd.s32 1, %s1146_s16 }
   0x7   : > { %s1385_s22 = smov (%p24_p0, %s23_s22), 0  ;;  %s1387_s23 = smov (!%p24_p0, %s26_s23), %s1162_s20 }
   0x8   : > { %p44_p3 = por %p43_p2, %p42_p1  ;;  %p28_p4 = scmp.ge.s32.totalorder %s1387_s23, 2 }
   0x9   : > { %s31_s24 = ssub.s32 %s1158_s19, %s1385_s22  ;;  %p822_p6 = scmp.ge.s32.totalorder %s1166_s21, 4 }
   0xa   : > { %s1389_s23 = smov (%p28_p4, %s1387_s23), 0 }
   0xb   : > { %s30_s25 = ssub.s32 %s1162_s20, %s1389_s23  ;;  %168 = sbr.rel (%p822_p6) target bundleno = 26 (0x1a), region = 24 }
   0xc   : > { %s32_s26 = sor.u32 %s31_s24, %s30_s25 }
   0xd   : > { %p33_p5 = scmp.eq.s32.totalorder %s32_s26, 0 }
   0xf   : > { %s1245_s28 = scalar_select %p33_p5, %s1146_s16, %s35_s27  }
  0x12   : > { %171 = sbr.rel (!%p44_p3) target bundleno = 26 (0x1a), region = 28  ;;  %s173_s29 = sand.u32 (%p44_p3), 1, %s1146_s16  }
  0x13   : > { %s846_s30 = sshll.u32 (%p44_p3), %s1162_s20, 3  ;;  %s823_s5 = sshll.u32 (%p44_p3), %s173_s29, 5 }
  0x14   : > { %s178_s6 = sadd.s32 (%p44_p3), %s1158_s19, %s846_s30  ;;  %s175_s11 = scalar_lea.vmem (%p44_p3), [#allocation3], %s823_s5 }
  0x15   : > { %s826_s7 = sshll.u32 (%p44_p3), %s178_s6, 3 }
  0x16   : > { %s180_s10 = scalar_lea.vmem (%p44_p3), %s1373_s0, %s826_s7 }
  0x17   : > { %v214_v0 = vld [vmem:[%s180_s10] sm:$0xff] (%p44_p3)  ;;  %v216_v1 = vld [vmem:[%s180_s10 + $0x10] sm:$0xff] (%p44_p3) }
  0x18   : > { %v218_v2 = vld [vmem:[%s180_s10 + $0x20] sm:$0xff] (%p44_p3)  ;;  %215 = vst [vmem:[%s175_s11] sm:$0xff] (%p44_p3), %v214_v0  ;;  %217 = vst [vmem:[%s175_s11 + $0x8] sm:$0xff] (%p44_p3), %v216_v1  ;;  %v220_v3 = vld [vmem:[%s180_s10 + $0x30] sm:$0xff] (%p44_p3) }
  0x19   : > { %219 = vst [vmem:[%s175_s11 + $0x10] sm:$0xff] %v218_v2  ;;  %221 = vst [vmem:[%s175_s11 + $0x18] sm:$0xff] %v220_v3 }
  0x1a PF: > { %p827_p7 = scmp.ge.s32.totalorder %s1166_s21, 1  ;;  %p235_p8 = scmp.lt.s32.totalorder %s1166_s21, 5 }
  0x1c   : > { %p236_p9 = pnand %p827_p7, %p235_p8 }
  0x1d   : > { %s242_s12 = sand.u32 (!%p236_p9), 1, %s1142_s15   ;;  %s829_s13 = sshll.u32 (!%p236_p9), %s1150_s17, 4 }
  0x1e   : > { %239 = sbr.rel (%p236_p9) target bundleno = 539 (0x21b), region = 70  ;;  %s828_s14 = sshll.u32 (!%p236_p9), %s242_s12, 5 }
  0x1f   : > { %p274_p10 = scmp.lt.s32.totalorder (!%p236_p9), %s829_s13, 31  ;;  %s831_s24 = sshll.u32 (!%p236_p9), %s1154_s18, 4 }
  0x20   : > { %p280_p11 = scmp.lt.s32.totalorder (!%p236_p9), %s831_s24, 31  ;;  %s1269_s15 = scalar_lea.vmem (!%p236_p9), [#allocation3], %s828_s14 }
  0x21   : > { %p833_p12 = scmp.ne.s32.totalorder (!%p236_p9), %s1150_s17, 0 }
  0x25   : > { %s1391_s13 = smov (!%p274_p10, %s829_s13), 31  ;;  %s1393_s24 = smov (!%p280_p11, %s831_s24), 31 }
  0x26   : > { %s830_s25 = sshll.u32 %s1391_s13, 2  ;;  %s832_s30 = sshll.u32 %s1393_s24, 3  ;;  %v1168_v4 = vmov (!%p833_p12), 0.0  }
  0x27   : > { %s1262_s29 = scalar_lea.vmem %s1374_s1, %s830_s25  ;;  %s1267_s7 = scalar_lea.vmem %s1377_s4, %s832_s30  ;;  %290 = vst [vmem:[#allocation2] sm:$0xff] (!%p833_p12), %v1168_v4  ;;  %291 = vst [vmem:[#allocation2 + $0x8] sm:$0xff] (!%p833_p12), %v1168_v4 }
  0x28   : > { %289 = sbr.rel (%p833_p12) target bundleno = 47 (0x2f), region = 78  ;;  %292 = vst [vmem:[#allocation2 + $0x10] sm:$0xff] (!%p833_p12), %v1168_v4  ;;  %293 = vst [vmem:[#allocation2 + $0x18] sm:$0xff] (!%p833_p12), %v1168_v4 }
  0x29   : > { %294 = vst [vmem:[#allocation2 + $0x20] sm:$0xff] (!%p833_p12), %v1168_v4  ;;  %295 = vst [vmem:[#allocation2 + $0x28] sm:$0xff] (!%p833_p12), %v1168_v4 }
  0x2a   : > { %296 = vst [vmem:[#allocation2 + $0x30] sm:$0xff] (!%p833_p12), %v1168_v4  ;;  %297 = vst [vmem:[#allocation2 + $0x38] sm:$0xff] (!%p833_p12), %v1168_v4 }
  0x2b   : > { %298 = vst [vmem:[#allocation2 + $0x40] sm:$0xff] (!%p833_p12), %v1168_v4  ;;  %299 = vst [vmem:[#allocation2 + $0x48] sm:$0xff] (!%p833_p12), %v1168_v4 }
  0x2c   : > { %300 = vst [vmem:[#allocation2 + $0x50] sm:$0xff] (!%p833_p12), %v1168_v4  ;;  %301 = vst [vmem:[#allocation2 + $0x58] sm:$0xff] (!%p833_p12), %v1168_v4 }
  0x2d   : > { %302 = vst [vmem:[#allocation2 + $0x60] sm:$0xff] (!%p833_p12), %v1168_v4  ;;  %303 = vst [vmem:[#allocation2 + $0x68] sm:$0xff] (!%p833_p12), %v1168_v4 }
  0x2e   : > { %304 = vst [vmem:[#allocation2 + $0x70] sm:$0xff] (!%p833_p12), %v1168_v4  ;;  %305 = vst [vmem:[#allocation2 + $0x78] sm:$0xff] (!%p833_p12), %v1168_v4 }
  0x2f PF: > { %v1104_v5 = vld [vmem:[%s1262_s29] sm:$0xff]   ;;  %v1105_v6 = vld [vmem:[%s1262_s29 + $0x8] sm:$0xff]   ;;  %v1106_v7 = vld [vmem:[%s1262_s29 + $0x10] sm:$0xff]   ;;  %p842_p13 = scmp.ne.s32.totalorder %s1150_s17, 1 }
  0x30   : > { %895 = vmatprep.subr.bf16.mxu0 %v1104_v5  ;;  %1015 = vmatprep.subr.bf16.mxu1 %v1104_v5  ;;  %v1107_v8 = vld [vmem:[%s1262_s29 + $0x18] sm:$0xff]   ;;  %v306_v9 = vld [vmem:[%s1269_s15] sm:$0xff]  ;;  %v308_v10 = vld [vmem:[%s1269_s15 + $0x10] sm:$0xff] }
  0x31   : > { %896 = vmatpush3.bf16.msra.mxu0 %v1104_v5  ;;  %1023 = vmatpush3.bf16.msra.mxu1 %v1104_v5  ;;  %v310_v11 = vunpack.c.l.s8.bf16 %v306_v9  ;;  %v314_v12 = vunpack.c.l.s8.bf16 %v308_v10  ;;  %v1108_v13 = vld [vmem:[%s1262_s29 + $0x20] sm:$0xff]   ;;  %v1109_v14 = vld [vmem:[%s1262_s29 + $0x28] sm:$0xff]   ;;  %v1110_v15 = vld [vmem:[%s1262_s29 + $0x30] sm:$0xff]   ;;  %v311_v19 = vunpack.c.h.s8.bf16 %v306_v9  ;;  %v315_v20 = vunpack.c.h.s8.bf16 %v308_v10 }
  0x32   : > { %897 = vmatprep.subr.bf16.mxu0 %v1105_v6  ;;  %1016 = vmatprep.subr.bf16.mxu1 %v1105_v6  ;;  %v1111_v16 = vld [vmem:[%s1262_s29 + $0x38] sm:$0xff]   ;;  %v307_v17 = vld [vmem:[%s1269_s15 + $0x8] sm:$0xff]  ;;  %v320_v25 = vld [vmem:[#allocation2 + $0x10] sm:$0xff] }
  0x33   : > { %911 = vmatprep.mubr.bf16.mxu0 %v310_v11  ;;  %919 = vmatprep.mubr.bf16.mxu1 %v314_v12  ;;  %v309_v18 = vld [vmem:[%s1269_s15 + $0x18] sm:$0xff]  ;;  %v312_v21 = vunpack.c.l.s8.bf16 %v307_v17  ;;  %v313_v23 = vunpack.c.h.s8.bf16 %v307_v17  ;;  %v328_v26 = vld [vmem:[#allocation2 + $0x50] sm:$0xff]  ;;  %v318_v27 = vld [vmem:[#allocation2] sm:$0xff] }
  0x34   : > { %v316_v22 = vunpack.c.l.s8.bf16 %v309_v18  ;;  %v317_v24 = vunpack.c.h.s8.bf16 %v309_v18  ;;  %v326_v28 = vld [vmem:[#allocation2 + $0x40] sm:$0xff]  ;;  %v321_v31 = vld [vmem:[#allocation2 + $0x18] sm:$0xff]  ;;  %v319_v37 = vld [vmem:[#allocation2 + $0x8] sm:$0xff] }
  0x35   : > { %898 = vmatpush3.bf16.msra.mxu0 %v1105_v6  ;;  %1024 = vmatpush3.bf16.msra.mxu1 %v1105_v6  ;;  %v329_v32 = vld [vmem:[#allocation2 + $0x58] sm:$0xff]  ;;  %v327_v38 = vld [vmem:[#allocation2 + $0x48] sm:$0xff]  ;;  %v324_v49 = vld [vmem:[#allocation2 + $0x30] sm:$0xff] }
  0x36   : > { %899 = vmatprep.subr.bf16.mxu0 %v1106_v7  ;;  %1017 = vmatprep.subr.bf16.mxu1 %v1106_v7  ;;  %v332_v50 = vld [vmem:[#allocation2 + $0x70] sm:$0xff]  ;;  %v322_v51 = vld [vmem:[#allocation2 + $0x20] sm:$0xff]  ;;  %v325_v55 = vld [vmem:[#allocation2 + $0x38] sm:$0xff] }
  0x37   : > { %v330_v52 = vld [vmem:[#allocation2 + $0x60] sm:$0xff]  ;;  %v333_v56 = vld [vmem:[#allocation2 + $0x78] sm:$0xff]  ;;  %v323_v61 = vld [vmem:[#allocation2 + $0x28] sm:$0xff] }
  0x38   : > { %v331_v62 = vld [vmem:[#allocation2 + $0x68] sm:$0xff]  ;;  %v547_v9 = vld [vmem:[%s1375_s2] sm:$0xff] (!%p842_p13)  ;;  %v549_v11 = vld [vmem:[%s1375_s2 + $0x10] sm:$0xff] (!%p842_p13) }
  0x39   : > { %900 = vmatpush3.bf16.msra.mxu0 %v1106_v7  ;;  %1025 = vmatpush3.bf16.msra.mxu1 %v1106_v7  ;;  %v548_v10 = vld [vmem:[%s1375_s2 + $0x8] sm:$0xff] (!%p842_p13) }
  0x3a   : > { %901 = vmatprep.subr.bf16.mxu0 %v1107_v8  ;;  %1018 = vmatprep.subr.bf16.mxu1 %v1107_v8  ;;  %v983_v12 = vpack.c.bf16 (!%p842_p13), %v548_v10, %v547_v9 }
  0x3d   : > { %902 = vmatpush3.bf16.msra.mxu0 %v1107_v8  ;;  %1026 = vmatpush3.bf16.msra.mxu1 %v1107_v8 }
  0x3e   : > { %903 = vmatprep.subr.bf16.mxu0 %v1108_v13  ;;  %1019 = vmatprep.subr.bf16.mxu1 %v1108_v13 }
  0x41   : > { %904 = vmatpush3.bf16.msra.mxu0 %v1108_v13  ;;  %1027 = vmatpush3.bf16.msra.mxu1 %v1108_v13  ;;  %v550_v13 = vld [vmem:[%s1375_s2 + $0x18] sm:$0xff] (!%p842_p13) }
  0x42   : > { %905 = vmatprep.subr.bf16.mxu0 %v1109_v14  ;;  %1020 = vmatprep.subr.bf16.mxu1 %v1109_v14 }
  0x45   : > { %906 = vmatpush3.bf16.msra.mxu0 %v1109_v14  ;;  %1028 = vmatpush3.bf16.msra.mxu1 %v1109_v14  ;;  %v987_v14 = vpack.c.bf16 (!%p842_p13), %v550_v13, %v549_v11 }
  0x46   : > { %907 = vmatprep.subr.bf16.mxu0 %v1110_v15  ;;  %1021 = vmatprep.subr.bf16.mxu1 %v1110_v15 }
  0x49   : > { %908 = vmatpush3.bf16.msra.mxu0 %v1110_v15  ;;  %1029 = vmatpush3.bf16.msra.mxu1 %v1110_v15  ;;  %v551_v15 = vld [vmem:[%s1375_s2 + $0x20] sm:$0xff] (!%p842_p13) }
  0x4a   : > { %909 = vmatprep.subr.bf16.mxu0 %v1111_v16  ;;  %1022 = vmatprep.subr.bf16.mxu1 %v1111_v16 }
  0x4d   : > { %910 = vmatpush3.bf16.msra.mxu0 %v1111_v16  ;;  %1030 = vmatpush3.bf16.msra.mxu1 %v1111_v16  ;;  %v552_v16 = vld [vmem:[%s1375_s2 + $0x28] sm:$0xff] (!%p842_p13) }
  0x4e   : > { %984 = vmatprep.subr.bf16.mxu0 (!%p842_p13), %v983_v12  ;;  %1031 = vmatprep.subr.bf16.mxu1 (!%p842_p13), %v983_v12  ;;  %v991_v17 = vpack.c.bf16 (!%p842_p13), %v552_v16, %v551_v15 }
  0x50   : > { %912 = vmatmul.mubr.bf16.vlgmr.msra.gmra.mrb[0].mxu0 %v311_v19  ;;  %920 = vmatmul.mubr.bf16.vlgmr.msra.gmra.mrb[0].mxu1 %v315_v20  ;;  %v553_v20 = vld [vmem:[%s1375_s2 + $0x30] sm:$0xff] (!%p842_p13) }
  0x51   : > { %915 = vmatprep.mubr.bf16.mxu0 %v312_v21  ;;  %923 = vmatprep.mubr.bf16.mxu1 %v316_v22  ;;  %v554_v21 = vld [vmem:[%s1375_s2 + $0x38] sm:$0xff] (!%p842_p13) }
  0x52   : > { %986 = vmatpush3.bf16.msra.mxu0 (!%p842_p13), %v983_v12  ;;  %1039 = vmatpush3.bf16.msra.mxu1 (!%p842_p13), %v983_v12  ;;  %v995_v22 = vpack.c.bf16 (!%p842_p13), %v554_v21, %v553_v20 }
  0x53   : > { %988 = vmatprep.subr.bf16.mxu0 (!%p842_p13), %v987_v14  ;;  %1032 = vmatprep.subr.bf16.mxu1 (!%p842_p13), %v987_v14 }
  0x56   : > { %990 = vmatpush3.bf16.msra.mxu0 (!%p842_p13), %v987_v14  ;;  %1040 = vmatpush3.bf16.msra.mxu1 (!%p842_p13), %v987_v14 }
  0x57   : > { %992 = vmatprep.subr.bf16.mxu0 (!%p842_p13), %v991_v17  ;;  %1033 = vmatprep.subr.bf16.mxu1 (!%p842_p13), %v991_v17 }
  0x58   : > { %916 = vmatmul.mubr.bf16.gmra.mrb[4].mxu0 %v313_v23  ;;  %924 = vmatmul.mubr.bf16.gmra.mrb[4].mxu1 %v317_v24  ;;  %v555_v23 = vld [vmem:[%s1375_s2 + $0x40] sm:$0xff] (!%p842_p13)  ;;  %v556_v24 = vld [vmem:[%s1375_s2 + $0x48] sm:$0xff] (!%p842_p13) }
  0x5a   : > { %994 = vmatpush3.bf16.msra.mxu0 (!%p842_p13), %v991_v17  ;;  %1041 = vmatpush3.bf16.msra.mxu1 (!%p842_p13), %v991_v17 }
  0x5b   : > { %996 = vmatprep.subr.bf16.mxu0 (!%p842_p13), %v995_v22  ;;  %1034 = vmatprep.subr.bf16.mxu1 (!%p842_p13), %v995_v22 }
  0x5e   : > { %998 = vmatpush3.bf16.msra.mxu0 (!%p842_p13), %v995_v22  ;;  %1042 = vmatpush3.bf16.msra.mxu1 (!%p842_p13), %v995_v22 }
 0x123   : > { %v913_v29 = vpop.f32.mrb[0].mxu0  ;;  %v921_v30 = vpop.f32.mrb[0].mxu1 }
 0x124   : > { %v497_v33 = vadd.f32 %v913_v29, %v320_v25  ;;  %v505_v34 = vadd.f32 %v921_v30, %v328_v26  ;;  %v432_v35 = vpop.f32.mrb[1].mxu0  ;;  %v464_v36 = vpop.f32.mrb[1].mxu1  ;;  %v999_v25 = vpack.c.bf16 (!%p842_p13), %v556_v24, %v555_v23  ;;  %v557_v26 = vld [vmem:[%s1375_s2 + $0x50] sm:$0xff] (!%p842_p13)  ;;  %v559_v29 = vld [vmem:[%s1375_s2 + $0x60] sm:$0xff] (!%p842_p13)  ;;  %v560_v30 = vld [vmem:[%s1375_s2 + $0x68] sm:$0xff] (!%p842_p13) }
 0x125   : > { %v495_v39 = vadd.f32 %v432_v35, %v318_v27  ;;  %v503_v40 = vadd.f32 %v464_v36, %v326_v28  ;;  %v914_v41 = vpop.f32.mrb[2].mxu0  ;;  %v922_v42 = vpop.f32.mrb[2].mxu1  ;;  %v558_v27 = vld [vmem:[%s1375_s2 + $0x58] sm:$0xff] (!%p842_p13) }
 0x126   : > { %513 = vst [vmem:[#allocation2 + $0x10] sm:$0xff] %v497_v33  ;;  %521 = vst [vmem:[#allocation2 + $0x50] sm:$0xff] %v505_v34  ;;  %v498_v43 = vadd.f32 %v914_v41, %v321_v31  ;;  %v506_v44 = vadd.f32 %v922_v42, %v329_v32  ;;  %v435_v45 = vpop.f32.mrb[3].mxu0  ;;  %v467_v46 = vpop.f32.mrb[3].mxu1  ;;  %1000 = vmatprep.subr.bf16.mxu0 (!%p842_p13), %v999_v25  ;;  %1035 = vmatprep.subr.bf16.mxu1 (!%p842_p13), %v999_v25  ;;  %v561_v32 = vld [vmem:[%s1375_s2 + $0x70] sm:$0xff] (!%p842_p13)  ;;  %v562_v33 = vld [vmem:[%s1375_s2 + $0x78] sm:$0xff] (!%p842_p13) }
 0x127   : > { %511 = vst [vmem:[#allocation2] sm:$0xff] %v495_v39  ;;  %519 = vst [vmem:[#allocation2 + $0x40] sm:$0xff] %v503_v40  ;;  %v496_v47 = vadd.f32 %v435_v45, %v319_v37  ;;  %v504_v48 = vadd.f32 %v467_v46, %v327_v38  ;;  %v1003_v28 = vpack.c.bf16 (!%p842_p13), %v558_v27, %v557_v26  ;;  %1002 = vmatpush3.bf16.msra.mxu0 (!%p842_p13), %v999_v25 }
 0x128   : > { %514 = vst [vmem:[#allocation2 + $0x18] sm:$0xff] %v498_v43  ;;  %522 = vst [vmem:[#allocation2 + $0x58] sm:$0xff] %v506_v44  ;;  %1043 = vmatpush3.bf16.msra.mxu1 (!%p842_p13), %v999_v25  ;;  %v1007_v31 = vpack.c.bf16 (!%p842_p13), %v560_v30, %v559_v29  ;;  %v1011_v34 = vpack.c.bf16 (!%p842_p13), %v562_v33, %v561_v32 }
 0x129   : > { %512 = vst [vmem:[#allocation2 + $0x8] sm:$0xff] %v496_v47  ;;  %520 = vst [vmem:[#allocation2 + $0x48] sm:$0xff] %v504_v48  ;;  %1004 = vmatprep.subr.bf16.mxu0 (!%p842_p13), %v1003_v28  ;;  %1036 = vmatprep.subr.bf16.mxu1 (!%p842_p13), %v1003_v28 }
 0x12b   : > { %v917_v53 = vpop.f32.mrb[4].mxu0  ;;  %v925_v54 = vpop.f32.mrb[4].mxu1  ;;  %530 = sbr.rel (%p842_p13) target bundleno = 539 (0x21b), region = 82  ;;  %1006 = vmatpush3.bf16.msra.mxu0 (!%p842_p13), %v1003_v28 }
 0x12c   : > { %v501_v57 = vadd.f32 %v917_v53, %v324_v49  ;;  %v509_v58 = vadd.f32 %v925_v54, %v332_v50  ;;  %v448_v59 = vpop.f32.mrb[5].mxu0  ;;  %v480_v60 = vpop.f32.mrb[5].mxu1  ;;  %1044 = vmatpush3.bf16.msra.mxu1 (!%p842_p13), %v1003_v28  ;;  %1008 = vmatprep.subr.bf16.mxu0 (!%p842_p13), %v1007_v31  ;;  %v843_v49 = vld [vmem:[%s1376_s3] ss:$0 sm:$0xff] (!%p842_p13) }
 0x12d   : > { %v499_v63 = vadd.f32 %v448_v59, %v322_v51  ;;  %v507_v0 = vadd.f32 %v480_v60, %v330_v52  ;;  %v918_v1 = vpop.f32.mrb[6].mxu0  ;;  %v926_v2 = vpop.f32.mrb[6].mxu1  ;;  %1037 = vmatprep.subr.bf16.mxu1 (!%p842_p13), %v1007_v31  ;;  %v533_v37 = vld [vmem:[#allocation2 + $0x10] sm:$0xff] (!%p842_p13) }
 0x12e   : > { %517 = vst [vmem:[#allocation2 + $0x30] sm:$0xff] %v501_v57  ;;  %525 = vst [vmem:[#allocation2 + $0x70] sm:$0xff] %v509_v58  ;;  %v502_v3 = vadd.f32 %v918_v1, %v325_v55  ;;  %v510_v4 = vadd.f32 %v926_v2, %v333_v56  ;;  %v451_v5 = vpop.f32.mrb[7].mxu0  ;;  %v483_v6 = vpop.f32.mrb[7].mxu1  ;;  %v531_v18 = vld [vmem:[#allocation2] sm:$0xff] (!%p842_p13)  ;;  %v541_v38 = vld [vmem:[#allocation2 + $0x50] sm:$0xff] (!%p842_p13) }
 0x12f   : > { %515 = vst [vmem:[#allocation2 + $0x20] sm:$0xff] %v499_v63  ;;  %523 = vst [vmem:[#allocation2 + $0x60] sm:$0xff] %v507_v0  ;;  %v500_v7 = vadd.f32 %v451_v5, %v323_v61  ;;  %v508_v8 = vadd.f32 %v483_v6, %v331_v62  ;;  %v539_v19 = vld [vmem:[#allocation2 + $0x40] sm:$0xff] (!%p842_p13)  ;;  %959 = vmatprep.mubr.f32.mxu0 (!%p842_p13), %v531_v18  ;;  %1010 = vmatpush3.bf16.msra.mxu0 (!%p842_p13), %v1007_v31  ;;  %v534_v39 = vld [vmem:[#allocation2 + $0x18] sm:$0xff] (!%p842_p13) }
 0x130   : > { %518 = vst [vmem:[#allocation2 + $0x38] sm:$0xff] %v502_v3  ;;  %526 = vst [vmem:[#allocation2 + $0x78] sm:$0xff] %v510_v4  ;;  %971 = vmatprep.mubr.f32.mxu1 (!%p842_p13), %v539_v19  ;;  %1045 = vmatpush3.bf16.msra.mxu1 (!%p842_p13), %v1007_v31  ;;  %v532_v35 = vld [vmem:[#allocation2 + $0x8] sm:$0xff] (!%p842_p13)  ;;  %v542_v40 = vld [vmem:[#allocation2 + $0x58] sm:$0xff] (!%p842_p13) }
 0x131   : > { %516 = vst [vmem:[#allocation2 + $0x28] sm:$0xff] %v500_v7  ;;  %524 = vst [vmem:[#allocation2 + $0x68] sm:$0xff] %v508_v8  ;;  %1012 = vmatprep.subr.bf16.mxu0 (!%p842_p13), %v1011_v34  ;;  %1038 = vmatprep.subr.bf16.mxu1 (!%p842_p13), %v1011_v34  ;;  %v540_v36 = vld [vmem:[#allocation2 + $0x48] sm:$0xff] (!%p842_p13) }
 0x133   : > { %1014 = vmatpush3.bf16.msra.mxu0 %v1011_v34 }
 0x134   : > { %1046 = vmatpush3.bf16.msra.mxu1 %v1011_v34 }
 0x135   : > { %v537_v45 = vld [vmem:[#allocation2 + $0x30] sm:$0xff] }
 0x136   : > { %960 = vmatmul.mubr.f32.vlgmr.msra.gmra.mrb[0].mxu0 %v532_v35  ;;  %v535_v41 = vld [vmem:[#allocation2 + $0x20] sm:$0xff]  ;;  %v545_v46 = vld [vmem:[#allocation2 + $0x70] sm:$0xff] }
 0x137   : > { %972 = vmatmul.mubr.f32.vlgmr.msra.gmra.mrb[0].mxu1 %v540_v36  ;;  %962 = vmatprep.mubr.f32.mxu0 %v533_v37  ;;  %v543_v42 = vld [vmem:[#allocation2 + $0x60] sm:$0xff]  ;;  %v538_v47 = vld [vmem:[#allocation2 + $0x38] sm:$0xff] }
 0x138   : > { %974 = vmatprep.mubr.f32.mxu1 %v541_v38  ;;  %v536_v43 = vld [vmem:[#allocation2 + $0x28] sm:$0xff]  ;;  %v546_v48 = vld [vmem:[#allocation2 + $0x78] sm:$0xff] }
 0x139   : > { %v544_v44 = vld [vmem:[#allocation2 + $0x68] sm:$0xff] }
 0x13a   : > { %963 = vmatmul.mubr.f32.gmra.mrb[2].mxu0 %v534_v39 }
 0x13b   : > { %975 = vmatmul.mubr.f32.gmra.mrb[2].mxu1 %v542_v40  ;;  %965 = vmatprep.mubr.f32.mxu0 %v535_v41 }
 0x13c   : > { %977 = vmatprep.mubr.f32.mxu1 %v543_v42 }
 0x13e   : > { %966 = vmatmul.mubr.f32.gmra.mrb[4].mxu0 %v536_v43 }
 0x13f   : > { %978 = vmatmul.mubr.f32.gmra.mrb[4].mxu1 %v544_v44  ;;  %968 = vmatprep.mubr.f32.mxu0 %v537_v45 }
 0x140   : > { %980 = vmatprep.mubr.f32.mxu1 %v545_v46 }
 0x142   : > { %969 = vmatmul.mubr.f32.gmra.mrb[6].mxu0 %v538_v47 }
 0x143   : > { %981 = vmatmul.mubr.f32.gmra.mrb[6].mxu1 %v546_v48 }
 0x209   : > { %v961_v50 = vpop.f32.mrb[0].mxu0 }
 0x20a   : > { %v973_v51 = vpop.f32.mrb[0].mxu1  ;;  %v642_v52 = vadd.f32 %v961_v50, %v843_v49  ;;  %v636_v54 = vpop.f32.mrb[1].mxu0 }
 0x20b   : > { %v682_v53 = vadd.f32 %v973_v51, %v843_v49  ;;  %v676_v55 = vpop.f32.mrb[1].mxu1  ;;  %v637_v56 = vadd.f32 %v843_v49, %v636_v54 }
 0x20c   : > { %v677_v57 = vadd.f32 %v843_v49, %v676_v55  ;;  %716 = vst [vmem:[%s1267_s7 + $0x8] sm:$0xff] %v642_v52 }
 0x20d   : > { %724 = vst [vmem:[%s1267_s7 + $0x48] sm:$0xff] %v682_v53  ;;  %715 = vst [vmem:[%s1267_s7] sm:$0xff] %v637_v56  ;;  %v964_v58 = vpop.f32.mrb[2].mxu0 }
 0x20e   : > { %723 = vst [vmem:[%s1267_s7 + $0x40] sm:$0xff] %v677_v57  ;;  %v976_v59 = vpop.f32.mrb[2].mxu1  ;;  %v652_v60 = vadd.f32 %v964_v58, %v843_v49  ;;  %v646_v62 = vpop.f32.mrb[3].mxu0 }
 0x20f   : > { %v692_v61 = vadd.f32 %v976_v59, %v843_v49  ;;  %v686_v63 = vpop.f32.mrb[3].mxu1  ;;  %v647_v0 = vadd.f32 %v843_v49, %v646_v62 }
 0x210   : > { %v687_v1 = vadd.f32 %v843_v49, %v686_v63  ;;  %718 = vst [vmem:[%s1267_s7 + $0x18] sm:$0xff] %v652_v60 }
 0x211   : > { %726 = vst [vmem:[%s1267_s7 + $0x58] sm:$0xff] %v692_v61  ;;  %717 = vst [vmem:[%s1267_s7 + $0x10] sm:$0xff] %v647_v0  ;;  %v967_v2 = vpop.f32.mrb[4].mxu0 }
 0x212   : > { %725 = vst [vmem:[%s1267_s7 + $0x50] sm:$0xff] %v687_v1  ;;  %v979_v3 = vpop.f32.mrb[4].mxu1  ;;  %v662_v4 = vadd.f32 %v967_v2, %v843_v49  ;;  %v656_v6 = vpop.f32.mrb[5].mxu0 }
 0x213   : > { %v702_v5 = vadd.f32 %v979_v3, %v843_v49  ;;  %v696_v7 = vpop.f32.mrb[5].mxu1  ;;  %v657_v8 = vadd.f32 %v843_v49, %v656_v6 }
 0x214   : > { %v697_v9 = vadd.f32 %v843_v49, %v696_v7  ;;  %720 = vst [vmem:[%s1267_s7 + $0x28] sm:$0xff] %v662_v4 }
 0x215   : > { %728 = vst [vmem:[%s1267_s7 + $0x68] sm:$0xff] %v702_v5  ;;  %719 = vst [vmem:[%s1267_s7 + $0x20] sm:$0xff] %v657_v8  ;;  %v970_v10 = vpop.f32.mrb[6].mxu0 }
 0x216   : > { %727 = vst [vmem:[%s1267_s7 + $0x60] sm:$0xff] %v697_v9  ;;  %v982_v11 = vpop.f32.mrb[6].mxu1  ;;  %v672_v12 = vadd.f32 %v970_v10, %v843_v49  ;;  %v666_v14 = vpop.f32.mrb[7].mxu0 }
 0x217   : > { %v712_v13 = vadd.f32 %v982_v11, %v843_v49  ;;  %v706_v15 = vpop.f32.mrb[7].mxu1  ;;  %v667_v16 = vadd.f32 %v843_v49, %v666_v14 }
 0x218   : > { %v707_v17 = vadd.f32 %v843_v49, %v706_v15  ;;  %722 = vst [vmem:[%s1267_s7 + $0x38] sm:$0xff] %v672_v12 }
 0x219   : > { %730 = vst [vmem:[%s1267_s7 + $0x78] sm:$0xff] %v712_v13  ;;  %721 = vst [vmem:[%s1267_s7 + $0x30] sm:$0xff] %v667_v16 }
 0x21a   : > { %729 = vst [vmem:[%s1267_s7 + $0x70] sm:$0xff] %v707_v17 }
 0x21b PF: > { %s14_s21 = sadd.s32 1, %s1166_s21   ;;  %s1378_s15 = smov %s1146_s16 }
 0x21c   : > { %p11_p0 = scmp.ge.s32.totalorder %s14_s21, 6   ;;  %s1379_s16 = smov %s1245_s28 }
 0x21d   : > { %s1380_s17 = smov %s1158_s19  ;;  %s1381_s18 = smov %s1162_s20 }
 0x21e   : > { %s1382_s19 = smov %s1385_s22  ;;  %s1383_s20 = smov %s1389_s23 }
 0x21f   :  { %13 = sbr.rel (!%p11_p0) target bundleno = 4 (0x4), region = 120 }

</bundles_post_ra>
